<compile_context>
chip_gen: v7x
topology: tpu7x:2x2x1
jax: 0.10.0
libtpu: 0.0.40
codegen_flags: <defaults>
</compile_context>

<pallas_src>
from functools import partial

import jax
import jax.numpy as jnp
from jax.experimental import pallas as pl
from jax.experimental.pallas import tpu as pltpu


# ----------------------------- Pallas kernel -------------------------------


def _make_fused_kernel(n_hidden):
    """Fused body for `n_hidden` (conv+BN+ReLU) blocks plus the out conv.

    Ref order: x_ref, [w0, s0, w1, s1, ..., w_out, b_out], o_ref
      x_ref : (1, Cin, TL) or (Cin, TL)   input tile, positions on lanes
      w_i   : (Cout_i, Cin_i)             conv weight with BN scale pre-folded
      s_i   : (Cout_i, 1)   float32       conv bias + BN shift pre-folded
      o_ref : (1, Cout, TL) or (Cout, TL)
    """

    def kernel(x_ref, *refs):
        o_ref = refs[-1]
        if len(x_ref.shape) == 3:                 # (1, Cin, TL) block
            h = x_ref[0].astype(jnp.float32)
        else:                                     # (Cin, TL) block
            h = x_ref[...].astype(jnp.float32)

        idx = 0
        out = None
        for layer in range(n_hidden + 1):
            w = refs[idx][...]                    # (Cout, Cin)
            s = refs[idx + 1][...]                # (Cout, 1), f32
            idx += 2
            cin = w.shape[1]
            if cin <= 8:
                # Tiny contraction dim: MXU would use only cin/256 of its K
                # lanes, and the VPU has huge slack here -> broadcast MACs.
                w32 = w.astype(jnp.float32)
                y = w32[:, 0:1] * h[0:1, :]
                for c in range(1, cin):
                    y = y + w32[:, c:c + 1] * h[c:c + 1, :]
            else:
                # MXU path; operands may be bf16, accumulation is f32.
                y = jnp.dot(w, h.astype(w.dtype),
                            preferred_element_type=jnp.float32)
            y = y + s
            if layer < n_hidden:
                h = jnp.maximum(y, 0.0)
                # Dropout1d: identity in eval mode.
            else:
                out = y

        if len(o_ref.shape) == 3:
            o_ref[0] = out.astype(o_ref.dtype)
        else:
            o_ref[...] = out.astype(o_ref.dtype)

    return kernel


# ------------------------------ Tiling helper -------------------------------


def _pick_tile(length, per_pos_bytes, *, budget=12 << 20, cap=8192):
    """Largest lane-dense tile along the position axis within the VMEM budget.

    Returns either the full axis (always a legal block) or a multiple of 128.
    """
    max_by_budget = max(128, budget // max(per_pos_bytes, 1))
    limit = min(max_by_budget, cap)
    if length <= limit:
        return length
    tl = limit - (limit % 128)
    return max(tl, 128)


# ------------------------------ Forward pass --------------------------------


@partial(jax.jit, static_argnames=("tile_l",))
def full_connected_conv1d_forward(x_ncl, params, tile_l=None):
    """x_ncl: (N, C_in, L) -> (N, C_out, L), matching the PyTorch module."""
    n, c_in, l = x_ncl.shape
    hidden = params["hidden"]
    w_out, b_out = params["out"]
    c_out = w_out.shape[0]
    n_hidden = len(hidden)

    flat = []
    chans = [c_in]
    for (w, s) in hidden:
        flat += [w, s]
        chans.append(w.shape[0])
    flat += [w_out, b_out]
    chans.append(c_out)

    # --- VMEM / cost bookkeeping ------------------------------------------
    x_bytes = x_ncl.dtype.itemsize
    o_bytes = x_bytes
    max_pair = max(chans[i] + chans[i + 1] for i in range(len(chans) - 1))
    # double-buffered in/out tiles + live f32 intermediates, with margin
    per_pos = int(1.25 * (2 * c_in * x_bytes + 2 * c_out * o_bytes + 6 * max_pair))
    weight_bytes = sum(int(a.size) * a.dtype.itemsize for a in flat)
    flops = 2 * n * l * sum(chans[i] * chans[i + 1] for i in range(len(chans) - 1))
    cost = pl.CostEstimate(
        flops=int(flops),
        transcendentals=0,
        bytes_accessed=int(x_ncl.size) * x_bytes + n * c_out * l * o_bytes
        + weight_bytes)

    kernel = _make_fused_kernel(n_hidden)
    const_specs = [pl.BlockSpec(a.shape, lambda i: (0, 0)) for a in flat]

    small_l = l < 128
    if small_l:
        # Fold batch into the position/lane axis (exact for k=1 convs) so
        # loads/stores are lane-dense and the flat grid can feed both v7x TCs.
        p = n * l
        x_in = jnp.transpose(x_ncl, (1, 0, 2)).reshape(c_in, p)
        tpos = min(tile_l, p) if tile_l is not None else _pick_tile(p, per_pos)
        grid = (pl.cdiv(p, tpos),)
        in_specs = [pl.BlockSpec((c_in, tpos), lambda i: (0, i))] + const_specs
        out_specs = pl.BlockSpec((c_out, tpos), lambda i: (0, i))
        out_shape = jax.ShapeDtypeStruct((c_out, p), x_ncl.dtype)
    else:
        # Native NCL; one flat parallel grid axis over (batch, L-tiles).
        # No pad/slice: cdiv grid, Pallas masks the partial tail block.
        x_in = x_ncl
        tpos = min(tile_l, l) if tile_l is not None else _pick_tile(l, per_pos)
        nlt = pl.cdiv(l, tpos)
        grid = (n * nlt,)
        in_specs = [pl.BlockSpec((1, c_in, tpos),
                                 lambda i: (i // nlt, 0, i % nlt))] + const_specs
        out_specs = pl.BlockSpec((1, c_out, tpos),
                                 lambda i: (i // nlt, 0, i % nlt))
        out_shape = jax.ShapeDtypeStruct((n, c_out, l), x_ncl.dtype)

    est = per_pos * tpos + weight_bytes
    vmem_limit = int(min(48 << 20, max(32 << 20, 2 * est)))

    out = pl.pallas_call(
        kernel,
        out_shape=out_shape,
        grid=grid,
        in_specs=in_specs,
        out_specs=out_specs,
        compiler_params=pltpu.CompilerParams(
            dimension_semantics=("parallel",),
            vmem_limit_bytes=vmem_limit),
        cost_estimate=cost,
    )(x_in, *flat)

    if small_l:
        out = out.reshape(c_out, n, l).transpose(1, 0, 2)
    return out


# ------------------------------- Parameters ---------------------------------


def init_raw_params(key, channels, bias=True, eps=1e-5):
    """Deterministic params mirroring the PyTorch module's shapes.

    Conv1d(cin, cout, 1): weight (cout, cin, 1) -> stored as (cout, cin);
                          bias   (cout,).
    BatchNorm1d(cout):    gamma/beta/running_mean/running_var (cout,).
    """
    n_layers = len(channels)
    raw = {"hidden": [], "out": None, "eps": eps}
    for i in range(n_layers - 2):
        cin, cout = channels[i], channels[i + 1]
        key, kw, kb, kg, kbe, km, kv = jax.random.split(key, 7)
        bound = 1.0 / (cin ** 0.5)
        w = jax.random.uniform(kw, (cout, cin), jnp.float32, -bound, bound)
        b = (jax.random.uniform(kb, (cout,), jnp.float32, -bound, bound)
             if bias else jnp.zeros((cout,), jnp.float32))
        gamma = jax.random.uniform(kg, (cout,), jnp.float32, 0.5, 1.5)
        beta = jax.random.uniform(kbe, (cout,), jnp.float32, -0.5, 0.5)
        mean = jax.random.uniform(km, (cout,), jnp.float32, -0.5, 0.5)
        var = jax.random.uniform(kv, (cout,), jnp.float32, 0.5, 1.5)
        raw["hidden"].append((w, b, gamma, beta, mean, var))

    cin, cout = channels[-2], channels[-1]
    key, kw, kb = jax.random.split(key, 3)
    bound = 1.0 / (cin ** 0.5)
    w = jax.random.uniform(kw, (cout, cin), jnp.float32, -bound, bound)
    b = (jax.random.uniform(kb, (cout,), jnp.float32, -bound, bound)
         if bias else jnp.zeros((cout,), jnp.float32))
    raw["out"] = (w, b)
    return raw


def fold_params(raw, param_dtype=jnp.float32):
    """Fold BN (eval mode) into the conv weight/bias once, outside the kernel.

    relu(((W x + b) - mean) * gamma / sqrt(var+eps) + beta)
      == relu((scale[:,None] * W) x + (b*scale + beta - mean*scale))

    param_dtype=jnp.bfloat16 feeds the MXU bf16 operands (v6e/v7x win); the
    per-channel shifts stay float32 so the post-matmul add/ReLU is f32.
    """
    eps = raw["eps"]
    params = {"hidden": [], "out": None}
    for (w, b, gamma, beta, mean, var) in raw["hidden"]:
        scale = gamma / jnp.sqrt(var + eps)                  # (Cout,)
        shift = beta - mean * scale                          # (Cout,)
        w_f = (w * scale[:, None]).astype(param_dtype)       # (Cout, Cin)
        s_f = (b * scale + shift)[:, None].astype(jnp.float32)  # (Cout, 1)
        params["hidden"].append((w_f, s_f))
    w_out, b_out = raw["out"]
    params["out"] = (w_out.astype(param_dtype),
                     b_out[:, None].astype(jnp.float32))
    return params


# ------------------------- Pure-JAX reference check -------------------------


def _reference_forward(x_ncl, raw):
    eps = raw["eps"]
    fea = x_ncl
    for (w, b, gamma, beta, mean, var) in raw["hidden"]:
        y = jnp.einsum("oc,ncl->nol", w, fea) + b[None, :, None]
        y = (y - mean[None, :, None]) / jnp.sqrt(var[None, :, None] + eps)
        y = y * gamma[None, :, None] + beta[None, :, None]
        fea = jnp.maximum(y, 0.0)
        # Dropout1d: identity in eval mode.
    w, b = raw["out"]
    return jnp.einsum("oc,ncl->nol", w, fea) + b[None, :, None]


if __name__ == "__main__":
    channels = [4, 32, 32, 8]   # channels[0]=input C, channels[-1]=output C

    key = jax.random.PRNGKey(0)
    key, kx = jax.random.split(key)

    # --- small-L case (L < 128): batch folded into the lane axis ------------
    N, L = 2, 16
    x = jax.random.normal(kx, (N, channels[0], L), jnp.float32)
    raw = init_raw_params(key, channels, bias=True)
    params_f32 = fold_params(raw)

    out = jax.block_until_ready(full_connected_conv1d_forward(x, params_f32))
    ref = _reference_forward(x, raw)
    assert out.shape == (N, channels[-1], L), out.shape
    assert jnp.allclose(out, ref, atol=1e-4, rtol=1e-4), "f32 mismatch vs reference"

    # bf16 MXU operands (v6e/v7x recommendation), f32 accumulation.
    params_bf16 = fold_params(raw, param_dtype=jnp.bfloat16)
    out_bf16 = jax.block_until_ready(
        full_connected_conv1d_forward(x, params_bf16))
    assert out_bf16.shape == (N, channels[-1], L), out_bf16.shape
    assert jnp.allclose(out_bf16, ref, atol=1e-1, rtol=1e-1), "bf16 mismatch vs reference"

    # --- larger-L case: flat (batch * L-tiles) grid with a partial tail -----
    key, kx2 = jax.random.split(key)
    N2, L2 = 2, 300             # 300 = 2*128 + 44 -> exercises the masked tail block
    x2 = jax.random.normal(kx2, (N2, channels[0], L2), jnp.float32)
    out2 = jax.block_until_ready(
        full_connected_conv1d_forward(x2, params_f32, tile_l=128))
    ref2 = _reference_forward(x2, raw)
    assert out2.shape == (N2, channels[-1], L2), out2.shape
    assert jnp.allclose(out2, ref2, atol=1e-4, rtol=1e-4), "tail-block mismatch vs reference"

    print("KERNEL_OK")
</pallas_src>

<mosaic_0001>
module attributes {stable_mosaic.version = 11 : i64} {
  func.func @kernel(%arg0: i32, %arg1: memref<4x32xf32, #tpu.memory_space<vmem>>, %arg2: memref<32x4xf32, #tpu.memory_space<vmem>>, %arg3: memref<32x1xf32, #tpu.memory_space<vmem>>, %arg4: memref<32x32xf32, #tpu.memory_space<vmem>>, %arg5: memref<32x1xf32, #tpu.memory_space<vmem>>, %arg6: memref<8x32xf32, #tpu.memory_space<vmem>>, %arg7: memref<8x1xf32, #tpu.memory_space<vmem>>, %arg8: memref<8x32xf32, #tpu.memory_space<vmem>>) attributes {dimension_semantics = [#tpu.dimension_semantics<parallel>], iteration_bounds = array<i64: 1>, scalar_prefetch = 0 : i64, scratch_operands = 0 : i64, tpu.core_type = #tpu.core_type<tc>, window_params = [{transform_indices = @transform_0, window_bounds = array<i64: 4, 32>}, {pipeline_mode = #tpu.pipeline_mode<synchronous>, transform_indices = @transform_1, window_bounds = array<i64: 32, 4>}, {pipeline_mode = #tpu.pipeline_mode<synchronous>, transform_indices = @transform_2, window_bounds = array<i64: 32, 1>}, {pipeline_mode = #tpu.pipeline_mode<synchronous>, transform_indices = @transform_3, window_bounds = array<i64: 32, 32>}, {pipeline_mode = #tpu.pipeline_mode<synchronous>, transform_indices = @transform_4, window_bounds = array<i64: 32, 1>}, {pipeline_mode = #tpu.pipeline_mode<synchronous>, transform_indices = @transform_5, window_bounds = array<i64: 8, 32>}, {pipeline_mode = #tpu.pipeline_mode<synchronous>, transform_indices = @transform_6, window_bounds = array<i64: 8, 1>}, {transform_indices = @transform_7, window_bounds = array<i64: 8, 32>}]} {
    %c0 = arith.constant 0 : index
    %c0_0 = arith.constant 0 : index
    %0 = vector.load %arg1[%c0, %c0_0] : memref<4x32xf32, #tpu.memory_space<vmem>>, vector<4x32xf32>
    %c0_1 = arith.constant 0 : index
    %c0_2 = arith.constant 0 : index
    %1 = vector.load %arg2[%c0_1, %c0_2] : memref<32x4xf32, #tpu.memory_space<vmem>>, vector<32x4xf32>
    %c0_3 = arith.constant 0 : index
    %c0_4 = arith.constant 0 : index
    %2 = vector.load %arg3[%c0_3, %c0_4] : memref<32x1xf32, #tpu.memory_space<vmem>>, vector<32x1xf32>
    %3 = vector.extract_strided_slice %1 {offsets = [0, 0], sizes = [32, 1], strides = [1, 1]} : vector<32x4xf32> to vector<32x1xf32>
    %4 = vector.extract_strided_slice %0 {offsets = [0, 0], sizes = [1, 32], strides = [1, 1]} : vector<4x32xf32> to vector<1x32xf32>
    %5 = vector.broadcast %3 : vector<32x1xf32> to vector<32x32xf32>
    %6 = vector.broadcast %4 : vector<1x32xf32> to vector<32x32xf32>
    %7 = arith.mulf %5, %6 : vector<32x32xf32>
    %8 = vector.extract_strided_slice %1 {offsets = [0, 1], sizes = [32, 1], strides = [1, 1]} : vector<32x4xf32> to vector<32x1xf32>
    %9 = vector.extract_strided_slice %0 {offsets = [1, 0], sizes = [1, 32], strides = [1, 1]} : vector<4x32xf32> to vector<1x32xf32>
    %10 = vector.broadcast %8 : vector<32x1xf32> to vector<32x32xf32>
    %11 = vector.broadcast %9 : vector<1x32xf32> to vector<32x32xf32>
    %12 = arith.mulf %10, %11 : vector<32x32xf32>
    %13 = arith.addf %7, %12 : vector<32x32xf32>
    %14 = vector.extract_strided_slice %1 {offsets = [0, 2], sizes = [32, 1], strides = [1, 1]} : vector<32x4xf32> to vector<32x1xf32>
    %15 = vector.extract_strided_slice %0 {offsets = [2, 0], sizes = [1, 32], strides = [1, 1]} : vector<4x32xf32> to vector<1x32xf32>
    %16 = vector.broadcast %14 : vector<32x1xf32> to vector<32x32xf32>
    %17 = vector.broadcast %15 : vector<1x32xf32> to vector<32x32xf32>
    %18 = arith.mulf %16, %17 : vector<32x32xf32>
    %19 = arith.addf %13, %18 : vector<32x32xf32>
    %20 = vector.extract_strided_slice %1 {offsets = [0, 3], sizes = [32, 1], strides = [1, 1]} : vector<32x4xf32> to vector<32x1xf32>
    %21 = vector.extract_strided_slice %0 {offsets = [3, 0], sizes = [1, 32], strides = [1, 1]} : vector<4x32xf32> to vector<1x32xf32>
    %22 = vector.broadcast %20 : vector<32x1xf32> to vector<32x32xf32>
    %23 = vector.broadcast %21 : vector<1x32xf32> to vector<32x32xf32>
    %24 = arith.mulf %22, %23 : vector<32x32xf32>
    %25 = arith.addf %19, %24 : vector<32x32xf32>
    %26 = vector.broadcast %2 : vector<32x1xf32> to vector<32x32xf32>
    %27 = arith.addf %25, %26 : vector<32x32xf32>
    %cst = arith.constant 0.000000e+00 : f32
    %28 = vector.broadcast %cst : f32 to vector<32x32xf32>
    %29 = arith.maximumf %27, %28 : vector<32x32xf32>
    %c0_5 = arith.constant 0 : index
    %c0_6 = arith.constant 0 : index
    %30 = vector.load %arg4[%c0_5, %c0_6] : memref<32x32xf32, #tpu.memory_space<vmem>>, vector<32x32xf32>
    %c0_7 = arith.constant 0 : index
    %c0_8 = arith.constant 0 : index
    %31 = vector.load %arg5[%c0_7, %c0_8] : memref<32x1xf32, #tpu.memory_space<vmem>>, vector<32x1xf32>
    %cst_9 = arith.constant dense<0.000000e+00> : vector<32x32xf32>
    %32 = tpu.matmul %30, %29, %cst_9 {dimension_numbers = #tpu.dot_dimension_numbers<[1], [0], [0], [1], [0, 0, 1, 1], [], []>} : vector<32x32xf32>, vector<32x32xf32>, vector<32x32xf32> -> vector<32x32xf32>
    %33 = vector.broadcast %31 : vector<32x1xf32> to vector<32x32xf32>
    %34 = arith.addf %32, %33 : vector<32x32xf32>
    %cst_10 = arith.constant 0.000000e+00 : f32
    %35 = vector.broadcast %cst_10 : f32 to vector<32x32xf32>
    %36 = arith.maximumf %34, %35 : vector<32x32xf32>
    %c0_11 = arith.constant 0 : index
    %c0_12 = arith.constant 0 : index
    %37 = vector.load %arg6[%c0_11, %c0_12] : memref<8x32xf32, #tpu.memory_space<vmem>>, vector<8x32xf32>
    %c0_13 = arith.constant 0 : index
    %c0_14 = arith.constant 0 : index
    %38 = vector.load %arg7[%c0_13, %c0_14] : memref<8x1xf32, #tpu.memory_space<vmem>>, vector<8x1xf32>
    %cst_15 = arith.constant dense<0.000000e+00> : vector<8x32xf32>
    %39 = tpu.matmul %37, %36, %cst_15 {dimension_numbers = #tpu.dot_dimension_numbers<[1], [0], [0], [1], [0, 0, 1, 1], [], []>} : vector<8x32xf32>, vector<32x32xf32>, vector<8x32xf32> -> vector<8x32xf32>
    %40 = vector.broadcast %38 : vector<8x1xf32> to vector<8x32xf32>
    %41 = arith.addf %39, %40 : vector<8x32xf32>
    %c0_16 = arith.constant 0 : index
    %c0_17 = arith.constant 0 : index
    %42 = vector.load %arg8[%c0_16, %c0_17] : memref<8x32xf32, #tpu.memory_space<vmem>>, vector<8x32xf32>
    tpu.vector_store %arg8[%c0_16, %c0_17], %41 {strides = array<i32>} : memref<8x32xf32, #tpu.memory_space<vmem>>, vector<8x32xf32>,
    return
  }
  func.func @transform_0(%arg0: i32) -> (i32, i32) {
    %c0_i32 = arith.constant 0 : i32
    %c0_i32_0 = arith.constant 0 : i32
    return %c0_i32, %arg0 : i32, i32
  }
  func.func @transform_1(%arg0: i32) -> (i32, i32) {
    %c0_i32 = arith.constant 0 : i32
    %c0_i32_0 = arith.constant 0 : i32
    %c0_i32_1 = arith.constant 0 : i32
    return %c0_i32, %c0_i32_0 : i32, i32
  }
  func.func @transform_2(%arg0: i32) -> (i32, i32) {
    %c0_i32 = arith.constant 0 : i32
    %c0_i32_0 = arith.constant 0 : i32
    %c0_i32_1 = arith.constant 0 : i32
    return %c0_i32, %c0_i32_0 : i32, i32
  }
  func.func @transform_3(%arg0: i32) -> (i32, i32) {
    %c0_i32 = arith.constant 0 : i32
    %c0_i32_0 = arith.constant 0 : i32
    %c0_i32_1 = arith.constant 0 : i32
    return %c0_i32, %c0_i32_0 : i32, i32
  }
  func.func @transform_4(%arg0: i32) -> (i32, i32) {
    %c0_i32 = arith.constant 0 : i32
    %c0_i32_0 = arith.constant 0 : i32
    %c0_i32_1 = arith.constant 0 : i32
    return %c0_i32, %c0_i32_0 : i32, i32
  }
  func.func @transform_5(%arg0: i32) -> (i32, i32) {
    %c0_i32 = arith.constant 0 : i32
    %c0_i32_0 = arith.constant 0 : i32
    %c0_i32_1 = arith.constant 0 : i32
    return %c0_i32, %c0_i32_0 : i32, i32
  }
  func.func @transform_6(%arg0: i32) -> (i32, i32) {
    %c0_i32 = arith.constant 0 : i32
    %c0_i32_0 = arith.constant 0 : i32
    %c0_i32_1 = arith.constant 0 : i32
    return %c0_i32, %c0_i32_0 : i32, i32
  }
  func.func @transform_7(%arg0: i32) -> (i32, i32) {
    %c0_i32 = arith.constant 0 : i32
    %c0_i32_0 = arith.constant 0 : i32
    return %c0_i32, %arg0 : i32, i32
  }
}

</mosaic_0001>

<bundles_post_ra>
// kernel: full_connected_conv1d_forward.1
= control target key start
LH: loop header
LB: loop body
LE: loop exit
PB: predicated region body
PF: predicated region fallthrough
CT: control target
= control target key end

     0   :  { %v465_v0 = vmov 3   ;;  %v466_v1 = vmov 1   ;;  %v467_v4 = vmov 2   ;;  %v468_v7 = vmov 0   ;;  %s578_s1 = inlined_call_operand.vmem [shape: f32[32,4], index: 1, kind: input, shape index: {}]   ;;  %s579_s2 = inlined_call_operand.vmem [shape: f32[32,1], index: 2, kind: input, shape index: {}]   ;;  %s580_s4 = inlined_call_operand.vmem [shape: f32[32,1], index: 4, kind: input, shape index: {}]   ;;  %s581_s6 = inlined_call_operand.vmem [shape: f32[8,1], index: 6, kind: input, shape index: {}]   ;;  %s582_s3 = inlined_call_operand.vmem [shape: f32[32,32], index: 3, kind: input, shape index: {}]   ;;  %s583_s0 = inlined_call_operand.vmem [shape: f32[4,32], index: 0, kind: input, shape index: {}]   ;;  %s584_s5 = inlined_call_operand.vmem [shape: f32[8,32], index: 5, kind: input, shape index: {}]   ;;  %s585_s7 = inlined_call_operand.vmem [shape: f32[8,32], index: 7, kind: output, shape index: {}]  }
   0x1   :  { %458 = vset.pattern.permute.xlu0 %v465_v0  ;;  %454 = vset.pattern.permute.xlu1 %v466_v1  ;;  %v27_v2 = vld [vmem:[%s578_s1] sm:$0xff]  ;;  %v28_v3 = vld [vmem:[%s578_s1 + $0x8] sm:$0xff]  ;;  %v30_v5 = vld [vmem:[%s578_s1 + $0x18] sm:$0xff]  ;;  %vm203_vm0 = vcmask 261120   ;;  %v55_v25 = vlaneseq  ;;  %vm470_vm1 = vmmov 0  }
   0x2   :  { %120 = vperm.xlu0 %458, %v27_v2   ;;  %64 = vperm.xlu1 %454, %v27_v2   ;;  %v29_v6 = vld [vmem:[%s578_s1 + $0x10] sm:$0xff]  ;;  %v31_v8 = vld [vmem:[%s579_s2] sm:$0xff]  ;;  %v34_v9 = vld [vmem:[%s579_s2 + $0x18] sm:$0xff] }
   0x3   :  { %v180_v10 = vld [vmem:[%s580_s4 + $0x8] sm:$0xff]  ;;  %v182_v11 = vld [vmem:[%s580_s4 + $0x18] sm:$0xff]  ;;  %v33_v13 = vld [vmem:[%s579_s2 + $0x10] sm:$0xff]  ;;  %v56_v28 = vshrl.u32 %v55_v25, 7 }
   0x4   :  { %v32_v12 = vld [vmem:[%s579_s2 + $0x8] sm:$0xff]  ;;  %v179_v14 = vld [vmem:[%s580_s4] sm:$0xff]  ;;  %v181_v15 = vld [vmem:[%s580_s4 + $0x10] sm:$0xff] }
   0x5   :  { %v175_v16 = vld [vmem:[%s582_s3] sm:$0xff]  ;;  %v57_v30 = vsub.s32 0, %v56_v28  ;;  %v81_v31 = vsub.s32 1, %v56_v28  ;;  %v109_v36 = vsub.s32 2, %v56_v28  ;;  %v137_v38 = vsub.s32 3, %v56_v28  ;;  %v178_v25 = vld [vmem:[%s582_s3 + $0x18] sm:$0xff] }
   0x6   :  { %459 = vset.pattern.permute.xlu0 %v467_v4  ;;  %68 = vperm.xlu1 %454, %v28_v3   ;;  %v306_v17 = vld [vmem:[%s581_s6] sm:$0xff] }
   0x7   :  { %92 = vperm.xlu0 %459, %v27_v2   ;;  %416 = vmatprep.mubr.msk.f32.mxu0 %vm203_vm0, %v175_v16  ;;  %v26_v32 = vld [vmem:[%s583_s0] sm:$0xf] }
   0x8   :  { %v58_v34 = vrot.slane %v26_v32, %v57_v30  ;;  %v82_v37 = vrot.slane %v26_v32, %v81_v31  ;;  %v110_v40 = vrot.slane %v26_v32, %v109_v36  ;;  %v138_v44 = vrot.slane %v26_v32, %v137_v38 }
   0xa   :  { %455 = vset.pattern.permute.xlu1 %v467_v4 }
   0xb   :  { %104 = vperm.xlu0 %459, %v30_v5   ;;  %96 = vperm.xlu1 %455, %v28_v3  }
   0xf   :  { %462 = vset.pattern.permute.xlu0 %v468_v7  ;;  %456 = vset.pattern.permute.xlu1 %v468_v7 }
  0x10   :  { %37 = vperm.xlu0 %462, %v27_v2   ;;  %47 = vperm.xlu1 %456, %v29_v6  }
  0x14   :  { %42 = vperm.xlu0 %462, %v28_v3   ;;  %457 = vset.pattern.permute.xlu1 %v466_v1 }
  0x15   :  { %72 = vperm.xlu1 %457, %v29_v6  }
  0x18   :  { %52 = vperm.xlu0 %462, %v30_v5  }
  0x19   :  { %76 = vperm.xlu1 %457, %v30_v5  }
  0x1c   :  { %149 = vperm.xlu0 %462, %v31_v8  }
  0x1d   :  { %460 = vset.pattern.permute.xlu1 %v465_v0 }
  0x1e   :  { %124 = vperm.xlu1 %460, %v28_v3  }
  0x20   :  { %164 = vperm.xlu0 %462, %v34_v9  }
  0x22   :  { %461 = vset.pattern.permute.xlu1 %v467_v4 }
  0x23   :  { %100 = vperm.xlu1 %461, %v29_v6  }
  0x24   :  { %190 = vperm.xlu0 %462, %v180_v10  }
  0x27   :  { %463 = vset.pattern.permute.xlu1 %v465_v0 }
  0x28   :  { %200 = vperm.xlu0 %462, %v182_v11   ;;  %128 = vperm.xlu1 %463, %v29_v6  }
  0x2c   :  { %132 = vperm.xlu1 %463, %v30_v5  }
  0x30   :  { %464 = vset.pattern.permute.xlu1 %v468_v7 }
  0x31   :  { %154 = vperm.xlu1 %464, %v32_v12  }
  0x35   :  { %159 = vperm.xlu1 %464, %v33_v13  }
  0x39   :  { %185 = vperm.xlu1 %464, %v179_v14  }
  0x3d   :  { %195 = vperm.xlu1 %464, %v181_v15  }
  0x41   :  { %309 = vperm.xlu1 %464, %v306_v17  }
  0x81   :  { %v65_v18 = vpop.permute.xlu1 %64  ;;  %v121_v19 = vpop.permute.xlu0 %120 }
  0x82   :  { %v83_v43 = vmul.f32 %v82_v37, %v65_v18  ;;  %v139_v52 = vmul.f32 %v138_v44, %v121_v19 }
  0x85   :  { %v69_v20 = vpop.permute.xlu1 %68 }
  0x86   :  { %v93_v21 = vpop.permute.xlu0 %92  ;;  %v84_v50 = vmul.f32 %v82_v37, %v69_v20 }
  0x87   :  { %v111_v45 = vmul.f32 %v110_v40, %v93_v21 }
  0x8a   :  { %v97_v22 = vpop.permute.xlu1 %96  ;;  %v105_v24 = vpop.permute.xlu0 %104 }
  0x8b   :  { %v114_v53 = vmul.f32 %v110_v40, %v105_v24  ;;  %v112_v58 = vmul.f32 %v110_v40, %v97_v22  ;;  %v177_v24 = vld [vmem:[%s582_s3 + $0x10] sm:$0xff] }
  0x8f   :  { %v48_v23 = vpop.permute.xlu1 %47  ;;  %v38_v27 = vpop.permute.xlu0 %37 }
  0x90   :  { %v59_v39 = vmul.f32 %v58_v34, %v38_v27  ;;  %v61_v61 = vmul.f32 %v58_v34, %v48_v23  ;;  %v176_v23 = vld [vmem:[%s582_s3 + $0x8] sm:$0xff]  ;;  %v471_v27 = vmov 0.0  }
  0x91   :  { %430 = vmatprep.mubr.msk.f32.mxu1 %vm470_vm1, %v471_v27 }
  0x92   :  { %v87_v46 = vadd.f32 %v83_v43, %v59_v39 }
  0x93   :  { %v43_v33 = vpop.permute.xlu0 %42 }
  0x94   :  { %v73_v26 = vpop.permute.xlu1 %72  ;;  %v60_v47 = vmul.f32 %v58_v34, %v43_v33  ;;  %v115_v56 = vadd.f32 %v111_v45, %v87_v46  ;;  %v305_v46 = vld [vmem:[%s584_s5] sm:$0xff] }
  0x95   :  { %v85_v57 = vmul.f32 %v82_v37, %v73_v26  ;;  %v469_v26 = vmov 0.0|0.0  }
  0x96   :  { %v88_v54 = vadd.f32 %v84_v50, %v60_v47  ;;  %v143_v0 = vadd.f32 %v139_v52, %v115_v56  ;;  %441 = vmatprep.subr.bf16.mxu1 %v469_v26 }
  0x97   :  { %v53_v41 = vpop.permute.xlu0 %52  ;;  %v89_v4 = vadd.f32 %v85_v57, %v61_v61 }
  0x98   :  { %v77_v29 = vpop.permute.xlu1 %76  ;;  %v62_v48 = vmul.f32 %v58_v34, %v53_v41  ;;  %v116_v3 = vadd.f32 %v112_v58, %v88_v54 }
  0x99   :  { %v86_v49 = vmul.f32 %v82_v37, %v77_v29 }
  0x9b   :  { %v90_v55 = vadd.f32 %v86_v49, %v62_v48  ;;  %v150_v62 = vpop.permute.xlu0 %149 }
  0x9c   :  { %v167_v5 = vadd.f32 %v150_v62, %v143_v0 }
  0x9d   :  { %v125_v35 = vpop.permute.xlu1 %124  ;;  %v118_v2 = vadd.f32 %v114_v53, %v90_v55 }
  0x9e   :  { %v140_v59 = vmul.f32 %v138_v44, %v125_v35  ;;  %v171_v13 = vmax.f32 %v167_v5, 0.0 }
  0x9f   :  { %v165_v12 = vpop.permute.xlu0 %164 }
  0xa0   :  { %v144_v8 = vadd.f32 %v140_v59, %v116_v3 }
  0xa2   :  { %v101_v42 = vpop.permute.xlu1 %100 }
  0xa3   :  { %v113_v1 = vmul.f32 %v110_v40, %v101_v42  ;;  %v191_v28 = vpop.permute.xlu0 %190 }
  0xa5   :  { %v117_v10 = vadd.f32 %v113_v1, %v89_v4 }
  0xa7   :  { %v129_v51 = vpop.permute.xlu1 %128  ;;  %v201_v35 = vpop.permute.xlu0 %200 }
  0xa8   :  { %v141_v6 = vmul.f32 %v138_v44, %v129_v51 }
  0xaa   :  { %v145_v16 = vadd.f32 %v141_v6, %v117_v10 }
  0xab   :  { %v133_v60 = vpop.permute.xlu1 %132 }
  0xac   :  { %v142_v63 = vmul.f32 %v138_v44, %v133_v60 }
  0xae   :  { %v146_v7 = vadd.f32 %v142_v63, %v118_v2 }
  0xb0   :  { %v155_v9 = vpop.permute.xlu1 %154  ;;  %v170_v14 = vadd.f32 %v165_v12, %v146_v7 }
  0xb1   :  { %v168_v11 = vadd.f32 %v155_v9, %v144_v8 }
  0xb2   :  { %v174_v21 = vmax.f32 %v170_v14, 0.0 }
  0xb3   :  { %v172_v15 = vmax.f32 %v168_v11, 0.0 }
  0xb4   :  { %v160_v17 = vpop.permute.xlu1 %159 }
  0xb5   :  { %v169_v18 = vadd.f32 %v160_v17, %v145_v16  ;;  %v433_v19 = vpack.c.bf16 %v172_v15, %v171_v13 }
  0xb7   :  { %v173_v20 = vmax.f32 %v169_v18, 0.0  ;;  %434 = vmatprep.subr.bf16.mxu0 %v433_v19 }
  0xb8   :  { %436 = vmatpush3.bf16.msra.mxu0 %v433_v19  ;;  %v186_v29 = vpop.permute.xlu1 %185 }
  0xb9   :  { %v437_v22 = vpack.c.bf16 %v174_v21, %v173_v20 }
  0xbb   :  { %438 = vmatprep.subr.bf16.mxu0 %v437_v22 }
  0xbc   :  { %440 = vmatpush3.bf16.msra.mxu0 %v437_v22  ;;  %v196_v38 = vpop.permute.xlu1 %195 }
  0xbf   :  { %417 = vmatmul.mubr.msk.f32.vlgmr.msra.gmra.mrb[0].mxu0 %vm203_vm0, %v176_v23 }
  0xc0   :  { %419 = vmatprep.mubr.msk.f32.mxu0 %vm203_vm0, %v177_v24  ;;  %v310_v47 = vpop.permute.xlu1 %309 }
  0xc3   :  { %420 = vmatmul.mubr.msk.f32.gmra.mrb[2].mxu0 %vm203_vm0, %v178_v25 }
 0x192   :  { %v418_v30 = vpop.f32.mrb[0].mxu0 }
 0x193   :  { %v288_v31 = vadd.f32 %v418_v30, %v191_v28  ;;  %v282_v32 = vpop.f32.mrb[1].mxu0 }
 0x194   :  { %v283_v33 = vadd.f32 %v282_v32, %v186_v29 }
 0x195   :  { %v302_v34 = vmax.f32 %v288_v31, 0.0 }
 0x196   :  { %v301_v36 = vmax.f32 %v283_v33, 0.0  ;;  %v421_v37 = vpop.f32.mrb[2].mxu0 }
 0x197   :  { %v298_v39 = vadd.f32 %v421_v37, %v201_v35  ;;  %v292_v40 = vpop.f32.mrb[3].mxu0 }
 0x198   :  { %v293_v41 = vadd.f32 %v292_v40, %v196_v38  ;;  %v442_v42 = vpack.c.bf16 %v302_v34, %v301_v36 }
 0x199   :  { %v304_v43 = vmax.f32 %v298_v39, 0.0 }
 0x19a   :  { %v303_v44 = vmax.f32 %v293_v41, 0.0  ;;  %443 = vmatpush3.bf16.msra.mxu1 %v442_v42 }
 0x19b   :  { %444 = vmatprep.subr.bf16.mxu1 %v469_v26 }
 0x19c   :  { %v445_v45 = vpack.c.bf16 %v304_v43, %v303_v44 }
 0x19e   :  { %446 = vmatpush3.bf16.msra.mxu1 %v445_v45 }
 0x1a1   :  { %431 = vmatmul.mubr.msk.f32.vlgmr.msra.gmra.mrb[0].mxu1 %vm203_vm0, %v305_v46 }
 0x274   :  { %v381_v48 = vpop.f32.mrb[0].mxu1 }
 0x275   :  { %v382_v49 = vadd.f32 %v381_v48, %v310_v47  ;;  %v432_v50 = vpop.f32.mrb[1].mxu1 }
 0x277   :  { %385 = vst.msk [vmem:[%s585_s7] sm:$0xff] %vm203_vm0, %v382_v49 }

</bundles_post_ra>
